<compile_context>
chip_gen: v5e
topology: v5e:2x2
jax: 0.10.0
libtpu: 0.0.40
codegen_flags: <defaults>
</compile_context>

<pallas_src>
import functools
import math

import jax
import jax.numpy as jnp
from jax.experimental import pallas as pl
from jax.experimental.pallas import tpu as pltpu


_NEG_BIG = -1e30   # "minus infinity" that never produces inf - inf = nan
_EPS = 1e-12       # guards 0/0 on all-zero rows / columns (padding)


def _arcface_kernel(emb_ref, ker_ref, lbl_ref, einv_ref, winv_ref, out_ref,
                    m_sc, l_sc, t_sc,
                    *, s, cos_m, sin_m, th, mm, easy_margin,
                    block_c, n_classes, mask_cols):
    j = pl.program_id(1)
    n_c_tiles = pl.num_programs(1)

    @pl.when(j == 0)
    def _init():
        m_sc[...] = jnp.full_like(m_sc, _NEG_BIG)
        l_sc[...] = jnp.zeros_like(l_sc)
        t_sc[...] = jnp.zeros_like(t_sc)

    # MXU matmul on the (bf16) raw inputs with f32 accumulation.  Both L2
    # norms AND the ArcFace scale s are folded into a cheap post-matmul
    # (TB,1) x (1,TC) rescale (precomputed in f32 outside the kernel).
    raw = jnp.dot(emb_ref[...], ker_ref[...],
                  preferred_element_type=jnp.float32)              # (TB, TC)
    cos_s = jnp.clip(raw * einv_ref[...] * winv_ref[...], -s, s)   # = s * cos

    # Local one-hot of the target column: the tile offset is folded into the
    # (TB,1) label (no full-tile index add).
    lbl_loc = lbl_ref[...] - j * block_c                           # (TB, 1)
    col = jax.lax.broadcasted_iota(jnp.int32, cos_s.shape, 1)      # (TB, TC)
    onehot = col == lbl_loc                                        # (TB, TC)
    hit = jnp.logical_and(lbl_loc >= 0, lbl_loc < block_c)         # (TB, 1)

    # Margin math — all (TB, 1).
    tgt = jnp.sum(jnp.where(onehot, cos_s, 0.0), axis=1,
                  keepdims=True) * (1.0 / s)                       # unscaled cos
    sin_t = jnp.sqrt(jnp.maximum(1.0 - tgt * tgt, 0.0))
    ctm = tgt * cos_m - sin_t * sin_m
    if easy_margin:
        fin = jnp.where(tgt > 0.0, ctm, tgt)
    else:
        fin = jnp.where(tgt > th, ctm, tgt - mm)
    fin_s = fin * s
    # Remember the (scaled) margin-adjusted target logit on the tile that
    # actually contains the target column.
    t_sc[...] = jnp.where(hit, fin_s, t_sc[...])

    # Scatter the margin-adjusted target back into this tile's logits.
    logits = jnp.where(onehot, fin_s, cos_s)                       # (TB, TC)

    def _accumulate(lg):
        m_prev = m_sc[...]
        m_new = jnp.maximum(m_prev, jnp.max(lg, axis=1, keepdims=True))
        alpha = jnp.exp(m_prev - m_new)
        l_sc[...] = alpha * l_sc[...] + jnp.sum(jnp.exp(lg - m_new),
                                                axis=1, keepdims=True)
        m_sc[...] = m_new

    if mask_cols:
        # Padded columns only exist in the last class tile — keep the masking
        # select off the hot path of every other tile.
        @pl.when(j < n_c_tiles - 1)
        def _():
            _accumulate(logits)

        @pl.when(j == n_c_tiles - 1)
        def _():
            _accumulate(jnp.where(col < n_classes - j * block_c,
                                  logits, _NEG_BIG))
    else:
        _accumulate(logits)

    @pl.when(j == n_c_tiles - 1)
    def _finalize():
        lse = m_sc[...] + jnp.log(l_sc[...])                       # (TB, 1)
        per_ex = lse - t_sc[...]                                   # (TB, 1)
        # Lane-broadcast so the store is lane-dense; wrapper reads column 0.
        out_ref[...] = jnp.broadcast_to(per_ex, out_ref.shape)


def _round_up(x, k):
    return -(-x // k) * k


def arcface_loss(embeddings, kernel, label, *, s=64.0, m=0.5,
                 easy_margin=False, block_b=512, block_c=512,
                 matmul_dtype=jnp.bfloat16):
    """ArcFace forward pass returning the scalar mean cross-entropy loss.

    `matmul_dtype` controls the dtype of the streamed matmul inputs
    (bfloat16 by default for HBM-bandwidth / MXU efficiency); the L2 norms,
    margin and softmax math always run in float32.
    """
    B, D = embeddings.shape
    Dk, C = kernel.shape
    assert D == Dk

    itemsize = jnp.dtype(matmul_dtype).itemsize
    row_gran = {1: 32, 2: 16}.get(itemsize, 8)

    tb = min(block_b, _round_up(B, row_gran))
    tb = _round_up(tb, row_gran)
    tc = min(block_c, _round_up(C, 128))
    tc = _round_up(tc, 128)

    # Generation-aware VMEM budget (v7x has 64 MiB / TensorCore).
    try:
        vmem_cap = int(pltpu.get_tpu_info().vmem_capacity_bytes)
    except Exception:  # pragma: no cover - conservative fallback
        vmem_cap = 64 << 20
    vmem_ceiling = max(vmem_cap - (8 << 20), 16 << 20)

    # v7x heuristic (64 MiB VMEM <=> 2 TCs/chip): prefer >=2 batch tiles so the
    # "parallel" batch axis feeds both TensorCores, as long as tb stays >=256.
    if vmem_cap <= (64 << 20):
        while _round_up(B, tb) // tb < 2 and tb >= 512:
            tb = _round_up(tb // 2, row_gran)

    def _vmem_est(tb_, tc_):
        return (2 * (tb_ * D + D * tc_) * itemsize        # pipelined matmul tiles
                + 2 * (2 * tb_ + tc_) * 4                 # labels, e_inv, s*w_inv
                + 2 * tb_ * 128 * 4                       # output block
                + 3 * tb_ * 4                             # scratch accumulators
                + 10 * tb_ * tc_ * 4                      # live f32 temporaries
                + (2 << 20))                              # headroom

    while _vmem_est(tb, tc) > vmem_ceiling and tb > row_gran:
        new_tb = max(row_gran, _round_up(tb // 2, row_gran))
        if new_tb >= tb:
            break
        tb = new_tb
    while _vmem_est(tb, tc) > vmem_ceiling and tc > 128:
        new_tc = max(128, _round_up(tc // 2, 128))
        if new_tc >= tc:
            break
        tc = new_tc

    b_pad = _round_up(B, tb)
    c_pad = _round_up(C, tc)

    # Inverse norms in f32 (once, outside the kernel); fold s into the column
    # norms so no full-tile `* s` is needed inside the kernel.
    emb32 = embeddings.astype(jnp.float32)
    ker32 = kernel.astype(jnp.float32)
    e_inv = jax.lax.rsqrt(jnp.sum(emb32 * emb32, axis=1, keepdims=True) + _EPS)
    w_inv_s = float(s) * jax.lax.rsqrt(
        jnp.sum(ker32 * ker32, axis=0, keepdims=True) + _EPS)

    if b_pad != B:
        embeddings = jnp.pad(embeddings, ((0, b_pad - B), (0, 0)))
        e_inv = jnp.pad(e_inv, ((0, b_pad - B), (0, 0)))
    if c_pad != C:
        kernel = jnp.pad(kernel, ((0, 0), (0, c_pad - C)))
        w_inv_s = jnp.pad(w_inv_s, ((0, 0), (0, c_pad - C)))
    label2d = jnp.pad(label.astype(jnp.int32).reshape(-1, 1),
                      ((0, b_pad - B), (0, 0)))

    emb_in = embeddings.astype(matmul_dtype)
    ker_in = kernel.astype(matmul_dtype)

    grid = (b_pad // tb, c_pad // tc)

    kern = functools.partial(
        _arcface_kernel,
        s=float(s),
        cos_m=math.cos(m),
        sin_m=math.sin(m),
        th=math.cos(math.pi - m),
        mm=math.sin(math.pi - m) * m,
        easy_margin=easy_margin,
        block_c=tc,
        n_classes=C,
        mask_cols=(c_pad != C),
    )

    vmem_limit = int(min(max(_vmem_est(tb, tc), 8 << 20), vmem_ceiling))

    per_example = pl.pallas_call(
        kern,
        out_shape=jax.ShapeDtypeStruct((b_pad, 128), jnp.float32),
        grid_spec=pltpu.PrefetchScalarGridSpec(
            num_scalar_prefetch=0,
            grid=grid,
            in_specs=[
                pl.BlockSpec((tb, D), lambda i, j: (i, 0)),   # embeddings
                pl.BlockSpec((D, tc), lambda i, j: (0, j)),   # weight tile
                pl.BlockSpec((tb, 1), lambda i, j: (i, 0)),   # labels
                pl.BlockSpec((tb, 1), lambda i, j: (i, 0)),   # 1/||e|| (f32)
                pl.BlockSpec((1, tc), lambda i, j: (0, j)),   # s/||w|| (f32)
            ],
            out_specs=pl.BlockSpec((tb, 128), lambda i, j: (i, 0)),
            scratch_shapes=[
                pltpu.VMEM((tb, 1), jnp.float32),   # running row max
                pltpu.VMEM((tb, 1), jnp.float32),   # running sum-exp
                pltpu.VMEM((tb, 1), jnp.float32),   # scaled target logit
            ]),
        compiler_params=pltpu.CompilerParams(
            dimension_semantics=("parallel", "arbitrary"),
            vmem_limit_bytes=vmem_limit),
    )(emb_in, ker_in, label2d, e_inv, w_inv_s)

    # Padded rows are simply sliced away; final mean uses the true batch size.
    return jnp.sum(per_example[:B, 0]) / B


if __name__ == "__main__":
    # Small shapes; deliberately non-multiples of the tile sizes so padding,
    # the last-tile column mask, multiple batch tiles and multi-tile online
    # softmax are all exercised.
    B, D, C = 13, 64, 250
    s, margin = 64.0, 0.5

    key = jax.random.PRNGKey(0)
    k_emb, k_ker, k_lbl = jax.random.split(key, 3)

    embeddings = jax.random.normal(k_emb, (B, D), dtype=jnp.float32)
    kernel = 0.01 * jax.random.normal(k_ker, (D, C), dtype=jnp.float32)  # std=0.01 init
    label = jax.random.randint(k_lbl, (B,), 0, C, dtype=jnp.int32)

    # Pure-JAX reference (mirrors the PyTorch module exactly, f32).
    en = embeddings / jnp.linalg.norm(embeddings, axis=1, keepdims=True)
    wn = kernel / jnp.linalg.norm(kernel, axis=0, keepdims=True)
    cos = jnp.clip(en @ wn, -1.0, 1.0)
    tgt = cos[jnp.arange(B), label][:, None]
    sin_t = jnp.sqrt(1.0 - tgt ** 2)
    ctm = tgt * math.cos(margin) - sin_t * math.sin(margin)
    fin = jnp.where(tgt > math.cos(math.pi - margin), ctm,
                    tgt - math.sin(math.pi - margin) * margin)
    onehot = jax.nn.one_hot(label, C, dtype=bool)
    logits = jnp.where(onehot, fin, cos) * s
    ref = jnp.mean(jax.nn.logsumexp(logits, axis=1) -
                   logits[jnp.arange(B), label])

    # 1) f32 matmul path, small tiles -> 2x2 grid (multi-tile softmax, padded
    #    rows and padded last class tile) -- tight tolerance vs reference.
    loss_f32 = arcface_loss(embeddings, kernel, label, s=s, m=margin,
                            easy_margin=False, block_b=8, block_c=128,
                            matmul_dtype=jnp.float32)
    loss_f32 = jax.block_until_ready(loss_f32)
    assert jnp.allclose(loss_f32, ref, rtol=1e-4, atol=1e-4), (loss_f32, ref)

    # 2) Default performance path (bf16 matmul stream) with small class tiles
    #    so the multi-class-tile accumulation runs in bf16 too.
    loss_bf16_tiled = arcface_loss(embeddings, kernel, label, s=s, m=margin,
                                   easy_margin=False, block_b=8, block_c=128)
    loss_bf16_tiled = jax.block_until_ready(loss_bf16_tiled)
    assert jnp.allclose(loss_bf16_tiled, ref, rtol=3e-2, atol=3e-1), (
        loss_bf16_tiled, ref)

    # 3) Default tile sizes (block_b=512, block_c=512) on the bf16 path.
    loss_bf16_default = arcface_loss(embeddings, kernel, label, s=s, m=margin)
    loss_bf16_default = jax.block_until_ready(loss_bf16_default)
    assert jnp.allclose(loss_bf16_default, ref, rtol=3e-2, atol=3e-1), (
        loss_bf16_default, ref)

    print("KERNEL_OK")
</pallas_src>

<mosaic_0001>
module attributes {stable_mosaic.version = 11 : i64} {
  func.func @_arcface_kernel(%arg0: i32, %arg1: i32, %arg2: memref<8x64xf32, #tpu.memory_space<vmem>>, %arg3: memref<64x128xf32, #tpu.memory_space<vmem>>, %arg4: memref<8x1xi32, #tpu.memory_space<vmem>>, %arg5: memref<8x1xf32, #tpu.memory_space<vmem>>, %arg6: memref<1x128xf32, #tpu.memory_space<vmem>>, %arg7: memref<8x128xf32, #tpu.memory_space<vmem>>, %arg8: memref<8x1xf32, #tpu.memory_space<vmem>>, %arg9: memref<8x1xf32, #tpu.memory_space<vmem>>, %arg10: memref<8x1xf32, #tpu.memory_space<vmem>>) attributes {dimension_semantics = [#tpu.dimension_semantics<parallel>, #tpu.dimension_semantics<arbitrary>], iteration_bounds = array<i64: 2, 2>, scalar_prefetch = 0 : i64, scratch_operands = 3 : i64, tpu.core_type = #tpu.core_type<tc>, window_params = [{transform_indices = @transform_0, window_bounds = array<i64: 8, 64>}, {transform_indices = @transform_1, window_bounds = array<i64: 64, 128>}, {transform_indices = @transform_2, window_bounds = array<i64: 8, 1>}, {transform_indices = @transform_3, window_bounds = array<i64: 8, 1>}, {transform_indices = @transform_4, window_bounds = array<i64: 1, 128>}, {transform_indices = @transform_5, window_bounds = array<i64: 8, 128>}]} {
    %c0_i32 = arith.constant 0 : i32
    %0 = arith.cmpi eq, %arg1, %c0_i32 : i32
    %1 = arith.extui %0 : i1 to i32
    %c0_i32_0 = arith.constant 0 : i32
    %2 = arith.cmpi ne, %1, %c0_i32_0 : i32
    scf.if %2 {
      %cst_33 = arith.constant -1.000000e+30 : f32
      %67 = vector.broadcast %cst_33 : f32 to vector<8x1xf32>
      %c0_34 = arith.constant 0 : index
      %c0_35 = arith.constant 0 : index
      %68 = vector.load %arg8[%c0_34, %c0_35] : memref<8x1xf32, #tpu.memory_space<vmem>>, vector<8x1xf32>
      tpu.vector_store %arg8[%c0_34, %c0_35], %67 {strides = array<i32>} : memref<8x1xf32, #tpu.memory_space<vmem>>, vector<8x1xf32>,
      %cst_36 = arith.constant 0.000000e+00 : f32
      %69 = vector.broadcast %cst_36 : f32 to vector<8x1xf32>
      %c0_37 = arith.constant 0 : index
      %c0_38 = arith.constant 0 : index
      %70 = vector.load %arg9[%c0_37, %c0_38] : memref<8x1xf32, #tpu.memory_space<vmem>>, vector<8x1xf32>
      tpu.vector_store %arg9[%c0_37, %c0_38], %69 {strides = array<i32>} : memref<8x1xf32, #tpu.memory_space<vmem>>, vector<8x1xf32>,
      %cst_39 = arith.constant 0.000000e+00 : f32
      %71 = vector.broadcast %cst_39 : f32 to vector<8x1xf32>
      %c0_40 = arith.constant 0 : index
      %c0_41 = arith.constant 0 : index
      %72 = vector.load %arg10[%c0_40, %c0_41] : memref<8x1xf32, #tpu.memory_space<vmem>>, vector<8x1xf32>
      tpu.vector_store %arg10[%c0_40, %c0_41], %71 {strides = array<i32>} : memref<8x1xf32, #tpu.memory_space<vmem>>, vector<8x1xf32>,
    } else {
    }
    %c0 = arith.constant 0 : index
    %c0_1 = arith.constant 0 : index
    %3 = vector.load %arg2[%c0, %c0_1] : memref<8x64xf32, #tpu.memory_space<vmem>>, vector<8x64xf32>
    %c0_2 = arith.constant 0 : index
    %c0_3 = arith.constant 0 : index
    %4 = vector.load %arg3[%c0_2, %c0_3] : memref<64x128xf32, #tpu.memory_space<vmem>>, vector<64x128xf32>
    %cst = arith.constant dense<0.000000e+00> : vector<8x128xf32>
    %5 = tpu.matmul %3, %4, %cst {dimension_numbers = #tpu.dot_dimension_numbers<[1], [0], [0], [1], [0, 0, 1, 1], [], []>} : vector<8x64xf32>, vector<64x128xf32>, vector<8x128xf32> -> vector<8x128xf32>
    %c0_4 = arith.constant 0 : index
    %c0_5 = arith.constant 0 : index
    %6 = vector.load %arg5[%c0_4, %c0_5] : memref<8x1xf32, #tpu.memory_space<vmem>>, vector<8x1xf32>
    %7 = vector.broadcast %6 : vector<8x1xf32> to vector<8x128xf32>
    %8 = arith.mulf %5, %7 : vector<8x128xf32>
    %c0_6 = arith.constant 0 : index
    %c0_7 = arith.constant 0 : index
    %9 = vector.load %arg6[%c0_6, %c0_7] : memref<1x128xf32, #tpu.memory_space<vmem>>, vector<1x128xf32>
    %10 = vector.broadcast %9 : vector<1x128xf32> to vector<8x128xf32>
    %11 = arith.mulf %8, %10 : vector<8x128xf32>
    %cst_8 = arith.constant -6.400000e+01 : f32
    %cst_9 = arith.constant 6.400000e+01 : f32
    %12 = vector.broadcast %cst_8 : f32 to vector<8x128xf32>
    %13 = arith.maximumf %12, %11 : vector<8x128xf32>
    %14 = vector.broadcast %cst_9 : f32 to vector<8x128xf32>
    %15 = arith.minimumf %14, %13 : vector<8x128xf32>
    %c0_10 = arith.constant 0 : index
    %c0_11 = arith.constant 0 : index
    %16 = vector.load %arg4[%c0_10, %c0_11] : memref<8x1xi32, #tpu.memory_space<vmem>>, vector<8x1xi32>
    %c128_i32 = arith.constant 128 : i32
    %17 = arith.muli %arg1, %c128_i32 : i32
    %18 = vector.broadcast %17 : i32 to vector<8x1xi32>
    %19 = arith.subi %16, %18 : vector<8x1xi32>
    %20 = tpu.iota {dimensions = array<i32: 1>} : vector<8x128xi32>
    %21 = vector.broadcast %19 : vector<8x1xi32> to vector<8x128xi32>
    %22 = arith.cmpi eq, %20, %21 : vector<8x128xi32>
    %c0_i32_12 = arith.constant 0 : i32
    %23 = vector.broadcast %c0_i32_12 : i32 to vector<8x1xi32>
    %24 = arith.cmpi sge, %19, %23 : vector<8x1xi32>
    %c128_i32_13 = arith.constant 128 : i32
    %25 = vector.broadcast %c128_i32_13 : i32 to vector<8x1xi32>
    %26 = arith.cmpi slt, %19, %25 : vector<8x1xi32>
    %27 = arith.andi %24, %26 : vector<8x1xi1>
    %cst_14 = arith.constant 0.000000e+00 : f32
    %28 = vector.broadcast %cst_14 : f32 to vector<8x128xf32>
    %29 = arith.select %22, %15, %28 : vector<8x128xi1>, vector<8x128xf32>
    %cst_15 = arith.constant dense<0.000000e+00> : vector<8xf32>
    %30 = vector.multi_reduction <add>, %29, %cst_15 [1] : vector<8x128xf32> to vector<8xf32>
    %31 = vector.shape_cast %30 : vector<8xf32> to vector<8x1xf32>
    %cst_16 = arith.constant 1.562500e-02 : f32
    %32 = vector.broadcast %cst_16 : f32 to vector<8x1xf32>
    %33 = arith.mulf %31, %32 : vector<8x1xf32>
    %34 = arith.mulf %33, %33 : vector<8x1xf32>
    %cst_17 = arith.constant 1.000000e+00 : f32
    %35 = vector.broadcast %cst_17 : f32 to vector<8x1xf32>
    %36 = arith.subf %35, %34 : vector<8x1xf32>
    %cst_18 = arith.constant 0.000000e+00 : f32
    %37 = vector.broadcast %cst_18 : f32 to vector<8x1xf32>
    %38 = arith.maximumf %36, %37 : vector<8x1xf32>
    %39 = math.sqrt %38 : vector<8x1xf32>
    %cst_19 = arith.constant 0.87758255 : f32
    %40 = vector.broadcast %cst_19 : f32 to vector<8x1xf32>
    %41 = arith.mulf %33, %40 : vector<8x1xf32>
    %cst_20 = arith.constant 0.47942555 : f32
    %42 = vector.broadcast %cst_20 : f32 to vector<8x1xf32>
    %43 = arith.mulf %39, %42 : vector<8x1xf32>
    %44 = arith.subf %41, %43 : vector<8x1xf32>
    %cst_21 = arith.constant -0.87758255 : f32
    %45 = vector.broadcast %cst_21 : f32 to vector<8x1xf32>
    %46 = arith.cmpf ogt, %33, %45 : vector<8x1xf32>
    %cst_22 = arith.constant 0.239712775 : f32
    %47 = vector.broadcast %cst_22 : f32 to vector<8x1xf32>
    %48 = arith.subf %33, %47 : vector<8x1xf32>
    %49 = arith.select %46, %44, %48 : vector<8x1xi1>, vector<8x1xf32>
    %cst_23 = arith.constant 6.400000e+01 : f32
    %50 = vector.broadcast %cst_23 : f32 to vector<8x1xf32>
    %51 = arith.mulf %49, %50 : vector<8x1xf32>
    %c0_24 = arith.constant 0 : index
    %c0_25 = arith.constant 0 : index
    %52 = vector.load %arg10[%c0_24, %c0_25] : memref<8x1xf32, #tpu.memory_space<vmem>>, vector<8x1xf32>
    %53 = arith.select %27, %51, %52 : vector<8x1xi1>, vector<8x1xf32>
    %c0_26 = arith.constant 0 : index
    %c0_27 = arith.constant 0 : index
    %54 = vector.load %arg10[%c0_26, %c0_27] : memref<8x1xf32, #tpu.memory_space<vmem>>, vector<8x1xf32>
    tpu.vector_store %arg10[%c0_26, %c0_27], %53 {strides = array<i32>} : memref<8x1xf32, #tpu.memory_space<vmem>>, vector<8x1xf32>,
    %55 = vector.shape_cast %51 : vector<8x1xf32> to vector<8x1xf32>
    %56 = vector.broadcast %55 : vector<8x1xf32> to vector<8x128xf32>
    %57 = arith.select %22, %56, %15 : vector<8x128xi1>, vector<8x128xf32>
    %c1_i32 = arith.constant 1 : i32
    %58 = arith.cmpi slt, %arg1, %c1_i32 : i32
    %59 = arith.extui %58 : i1 to i32
    %c0_i32_28 = arith.constant 0 : i32
    %60 = arith.cmpi ne, %59, %c0_i32_28 : i32
    scf.if %60 {
      %c0_33 = arith.constant 0 : index
      %c0_34 = arith.constant 0 : index
      %67 = vector.load %arg8[%c0_33, %c0_34] : memref<8x1xf32, #tpu.memory_space<vmem>>, vector<8x1xf32>
      %cst_35 = arith.constant dense<0xFF800000> : vector<8xf32>
      %68 = vector.multi_reduction <maximumf>, %57, %cst_35 [1] : vector<8x128xf32> to vector<8xf32>
      %69 = vector.shape_cast %68 : vector<8xf32> to vector<8x1xf32>
      %70 = arith.maximumf %67, %69 : vector<8x1xf32>
      %71 = arith.subf %67, %70 : vector<8x1xf32>
      %72 = math.exp %71 : vector<8x1xf32>
      %c0_36 = arith.constant 0 : index
      %c0_37 = arith.constant 0 : index
      %73 = vector.load %arg9[%c0_36, %c0_37] : memref<8x1xf32, #tpu.memory_space<vmem>>, vector<8x1xf32>
      %74 = arith.mulf %72, %73 : vector<8x1xf32>
      %75 = vector.broadcast %70 : vector<8x1xf32> to vector<8x128xf32>
      %76 = arith.subf %57, %75 : vector<8x128xf32>
      %77 = math.exp %76 : vector<8x128xf32>
      %cst_38 = arith.constant dense<0.000000e+00> : vector<8xf32>
      %78 = vector.multi_reduction <add>, %77, %cst_38 [1] : vector<8x128xf32> to vector<8xf32>
      %79 = vector.shape_cast %78 : vector<8xf32> to vector<8x1xf32>
      %80 = arith.addf %74, %79 : vector<8x1xf32>
      %c0_39 = arith.constant 0 : index
      %c0_40 = arith.constant 0 : index
      %81 = vector.load %arg9[%c0_39, %c0_40] : memref<8x1xf32, #tpu.memory_space<vmem>>, vector<8x1xf32>
      tpu.vector_store %arg9[%c0_39, %c0_40], %80 {strides = array<i32>} : memref<8x1xf32, #tpu.memory_space<vmem>>, vector<8x1xf32>,
      %c0_41 = arith.constant 0 : index
      %c0_42 = arith.constant 0 : index
      %82 = vector.load %arg8[%c0_41, %c0_42] : memref<8x1xf32, #tpu.memory_space<vmem>>, vector<8x1xf32>
      tpu.vector_store %arg8[%c0_41, %c0_42], %70 {strides = array<i32>} : memref<8x1xf32, #tpu.memory_space<vmem>>, vector<8x1xf32>,
    } else {
    }
    %c1_i32_29 = arith.constant 1 : i32
    %61 = arith.cmpi eq, %arg1, %c1_i32_29 : i32
    %62 = arith.extui %61 : i1 to i32
    %c0_i32_30 = arith.constant 0 : i32
    %63 = arith.cmpi ne, %62, %c0_i32_30 : i32
    scf.if %63 {
      %c128_i32_33 = arith.constant 128 : i32
      %67 = arith.muli %arg1, %c128_i32_33 : i32
      %c250_i32 = arith.constant 250 : i32
      %68 = arith.subi %c250_i32, %67 : i32
      %69 = vector.broadcast %68 : i32 to vector<8x128xi32>
      %70 = arith.cmpi slt, %20, %69 : vector<8x128xi32>
      %cst_34 = arith.constant -1.000000e+30 : f32
      %71 = vector.broadcast %cst_34 : f32 to vector<8x128xf32>
      %72 = arith.select %70, %57, %71 : vector<8x128xi1>, vector<8x128xf32>
      %c0_35 = arith.constant 0 : index
      %c0_36 = arith.constant 0 : index
      %73 = vector.load %arg8[%c0_35, %c0_36] : memref<8x1xf32, #tpu.memory_space<vmem>>, vector<8x1xf32>
      %cst_37 = arith.constant dense<0xFF800000> : vector<8xf32>
      %74 = vector.multi_reduction <maximumf>, %72, %cst_37 [1] : vector<8x128xf32> to vector<8xf32>
      %75 = vector.shape_cast %74 : vector<8xf32> to vector<8x1xf32>
      %76 = arith.maximumf %73, %75 : vector<8x1xf32>
      %77 = arith.subf %73, %76 : vector<8x1xf32>
      %78 = math.exp %77 : vector<8x1xf32>
      %c0_38 = arith.constant 0 : index
      %c0_39 = arith.constant 0 : index
      %79 = vector.load %arg9[%c0_38, %c0_39] : memref<8x1xf32, #tpu.memory_space<vmem>>, vector<8x1xf32>
      %80 = arith.mulf %78, %79 : vector<8x1xf32>
      %81 = vector.broadcast %76 : vector<8x1xf32> to vector<8x128xf32>
      %82 = arith.subf %72, %81 : vector<8x128xf32>
      %83 = math.exp %82 : vector<8x128xf32>
      %cst_40 = arith.constant dense<0.000000e+00> : vector<8xf32>
      %84 = vector.multi_reduction <add>, %83, %cst_40 [1] : vector<8x128xf32> to vector<8xf32>
      %85 = vector.shape_cast %84 : vector<8xf32> to vector<8x1xf32>
      %86 = arith.addf %80, %85 : vector<8x1xf32>
      %c0_41 = arith.constant 0 : index
      %c0_42 = arith.constant 0 : index
      %87 = vector.load %arg9[%c0_41, %c0_42] : memref<8x1xf32, #tpu.memory_space<vmem>>, vector<8x1xf32>
      tpu.vector_store %arg9[%c0_41, %c0_42], %86 {strides = array<i32>} : memref<8x1xf32, #tpu.memory_space<vmem>>, vector<8x1xf32>,
      %c0_43 = arith.constant 0 : index
      %c0_44 = arith.constant 0 : index
      %88 = vector.load %arg8[%c0_43, %c0_44] : memref<8x1xf32, #tpu.memory_space<vmem>>, vector<8x1xf32>
      tpu.vector_store %arg8[%c0_43, %c0_44], %76 {strides = array<i32>} : memref<8x1xf32, #tpu.memory_space<vmem>>, vector<8x1xf32>,
    } else {
    }
    %c1_i32_31 = arith.constant 1 : i32
    %64 = arith.cmpi eq, %arg1, %c1_i32_31 : i32
    %65 = arith.extui %64 : i1 to i32
    %c0_i32_32 = arith.constant 0 : i32
    %66 = arith.cmpi ne, %65, %c0_i32_32 : i32
    scf.if %66 {
      %c0_33 = arith.constant 0 : index
      %c0_34 = arith.constant 0 : index
      %67 = vector.load %arg8[%c0_33, %c0_34] : memref<8x1xf32, #tpu.memory_space<vmem>>, vector<8x1xf32>
      %c0_35 = arith.constant 0 : index
      %c0_36 = arith.constant 0 : index
      %68 = vector.load %arg9[%c0_35, %c0_36] : memref<8x1xf32, #tpu.memory_space<vmem>>, vector<8x1xf32>
      %69 = math.log %68 : vector<8x1xf32>
      %70 = arith.addf %67, %69 : vector<8x1xf32>
      %c0_37 = arith.constant 0 : index
      %c0_38 = arith.constant 0 : index
      %71 = vector.load %arg10[%c0_37, %c0_38] : memref<8x1xf32, #tpu.memory_space<vmem>>, vector<8x1xf32>
      %72 = arith.subf %70, %71 : vector<8x1xf32>
      %73 = vector.shape_cast %72 : vector<8x1xf32> to vector<8x1xf32>
      %74 = vector.broadcast %73 : vector<8x1xf32> to vector<8x128xf32>
      %c0_39 = arith.constant 0 : index
      %c0_40 = arith.constant 0 : index
      %75 = vector.load %arg7[%c0_39, %c0_40] : memref<8x128xf32, #tpu.memory_space<vmem>>, vector<8x128xf32>
      tpu.vector_store %arg7[%c0_39, %c0_40], %74 {strides = array<i32>} : memref<8x128xf32, #tpu.memory_space<vmem>>, vector<8x128xf32>,
    } else {
    }
    return
  }
  func.func @transform_0(%arg0: i32, %arg1: i32) -> (i32, i32) {
    %c0_i32 = arith.constant 0 : i32
    %c0_i32_0 = arith.constant 0 : i32
    return %arg0, %c0_i32 : i32, i32
  }
  func.func @transform_1(%arg0: i32, %arg1: i32) -> (i32, i32) {
    %c0_i32 = arith.constant 0 : i32
    %c0_i32_0 = arith.constant 0 : i32
    return %c0_i32, %arg1 : i32, i32
  }
  func.func @transform_2(%arg0: i32, %arg1: i32) -> (i32, i32) {
    %c0_i32 = arith.constant 0 : i32
    %c0_i32_0 = arith.constant 0 : i32
    return %arg0, %c0_i32 : i32, i32
  }
  func.func @transform_3(%arg0: i32, %arg1: i32) -> (i32, i32) {
    %c0_i32 = arith.constant 0 : i32
    %c0_i32_0 = arith.constant 0 : i32
    return %arg0, %c0_i32 : i32, i32
  }
  func.func @transform_4(%arg0: i32, %arg1: i32) -> (i32, i32) {
    %c0_i32 = arith.constant 0 : i32
    %c0_i32_0 = arith.constant 0 : i32
    return %c0_i32, %arg1 : i32, i32
  }
  func.func @transform_5(%arg0: i32, %arg1: i32) -> (i32, i32) {
    %c0_i32 = arith.constant 0 : i32
    %c0_i32_0 = arith.constant 0 : i32
    return %arg0, %c0_i32 : i32, i32
  }
}

</mosaic_0001>

<bundles_post_ra>
// kernel: tpu_custom_call.1
= control target key start
LH: loop header
LB: loop body
LE: loop exit
PB: predicated region body
PF: predicated region fallthrough
CT: control target
= control target key end

     0   :  { %s1214_s0 = inlined_call_operand.vmem [shape: f32[16,64], index: 0, kind: input, shape index: {}]   ;;  %s1215_s1 = inlined_call_operand.hbm [shape: f32[64,256], index: 1, kind: input, shape index: {}]   ;;  %s1216_s2 = inlined_call_operand.vmem [shape: s32[16,1], index: 2, kind: input, shape index: {}]   ;;  %s1217_s3 = inlined_call_operand.vmem [shape: f32[16,1], index: 3, kind: input, shape index: {}]   ;;  %s1218_s4 = inlined_call_operand.vmem [shape: f32[1,256], index: 4, kind: input, shape index: {}]   ;;  %s1219_s5 = inlined_call_operand.hbm [shape: f32[16,128], index: 5, kind: output, shape index: {}]  }
   0x1   :  { %1226 = sst [smem:[#allocation18_spill]] %s1215_s1 }
   0x2   :  { %10 = vsyncpa [#allocation6], 0 }
   0x3   :  { %12 = vsyncpa [#allocation6 + $0x1], 0 }
   0x4   :  { %13 = vsyncpa [#allocation7], 0 }
   0x5   :  { %15 = vsyncpa [#allocation7 + $0x1], 0  ;;  %s973_s18 = smov 0   ;;  %s975_s19 = smov 0  }
   0x6   :  { %s977_s20 = smov 0   ;;  %s979_s21 = smov 0  }
   0x7   :  { %s981_s22 = smov 0   ;;  %s983_s23 = smov 0  }
   0x8   :  { %s985_s24 = smov 0   ;;  %s987_s25 = smov 0  }
   0x9   :  { %s989_s26 = smov 0   ;;  %s991_s27 = smov 0  }
   0xa   :  { %s993_s28 = smov 0  }
   0xb LB: > { %1227 = sst [smem:[#allocation11_spill]] %s913_s23  ;;  %s631_s29 = sadd.s32 4294967295, %s933_s28   ;;  %s933_s28 = sphi %s993_s28, %s21_s28   ;;  %s929_s27 = sphi %s991_s27, %s1246_s27   ;;  %s925_s26 = sphi %s989_s26, %s1245_s26   ;;  %s921_s25 = sphi %s987_s25, %s1244_s25   ;;  %s917_s24 = sphi %s985_s24, %s1243_s24   ;;  %s913_s23 = sphi %s983_s23, %s1242_s23   ;;  %s909_s22 = sphi %s981_s22, %s1251_s22   ;;  %s905_s21 = sphi %s979_s21, %s1250_s21   ;;  %s901_s20 = sphi %s977_s20, %s1249_s20   ;;  %s897_s19 = sphi %s975_s19, %s1248_s19   ;;  %s893_s18 = sphi %s973_s18, %s1247_s18  }
   0xc   : > { %1228 = sst [smem:[#allocation12_spill]] %s925_s26  ;;  %s632_s30 = sadd.s32 4294967294, %s933_s28  }
   0xd   : > { %1229 = sst [smem:[#allocation13_spill]] %s929_s27  ;;  %s30_s6 = sadd.s32 1, %s925_s26 }
   0xe   : > { %s33_s7 = sadd.s32 1, %s929_s27  ;;  %p31_p0 = scmp.ge.s32.totalorder %s30_s6, 2 }
   0xf   : > { %s66_s8 = sadd.s32 1, %s913_s23  ;;  %p73_p1 = scmp.ne.s32.totalorder %s913_s23, %s909_s22 }
  0x10   : > { %p74_p2 = scmp.eq.s32.totalorder %s933_s28, 0  ;;  %s1253_s6 = smov (%p31_p0, %s30_s6), 0 }
  0x11   : > { %1230 = sst [smem:[#allocation14_spill]] %s1253_s6  ;;  %s1255_s7 = smov (!%p31_p0, %s33_s7), %s929_s27 }
  0x12   : > { %s63_s9 = ssub.s32 %s925_s26, %s1253_s6  ;;  %p1039_p3 = por %p74_p2, %p73_p1 }
  0x13   : > { %p35_p4 = scmp.ge.s32.totalorder %s1255_s7, 2  ;;  %p64_p5 = scmp.eq.s32.totalorder %s63_s9, 0 }
  0x14   : > { %p79_p6 = scmp.ne.s32.totalorder %s909_s22, %s905_s21  ;;  %p80_p7 = scmp.eq.s32.totalorder %s631_s29, 0 }
  0x15   : > { %s1257_s7 = smov (%p35_p4, %s1255_s7), 0  ;;  %s170_s14 = sadd.s32 1, %s901_s20 }
  0x16   : > { %1232 = sst [smem:[#allocation15_spill]] %s1257_s7  ;;  %p1049_p8 = por %p80_p7, %p79_p6 }
  0x17   : > { %s1047_s11 = scalar_select %p64_p5, %s913_s23, %s66_s8  }
  0x18   : > { %s167_s13 = ssub.s32 %s929_s27, %s1257_s7  ;;  %p180_p10 = scmp.ne.s32.totalorder %s901_s20, %s897_s19 }
  0x19   : > { %1233 = sst [smem:[#allocation16_spill]] %s1047_s11  ;;  %p168_p9 = scmp.eq.s32.totalorder %s167_s13, 0 }
  0x1a   : > { %p181_p11 = scmp.eq.s32.totalorder %s631_s29, 3  ;;  %p186_p13 = scmp.ne.s32.totalorder %s897_s19, %s893_s18 }
  0x1b   : > { %s1059_s15 = scalar_select %p168_p9, %s901_s20, %s170_s14  }
  0x1c   : > { %p1061_p12 = por %p181_p11, %p180_p10  ;;  %p187_p0 = scmp.eq.s32.totalorder %s632_s30, 3 }
  0x1d   : > { %1235 = sst [smem:[#allocation17_spill]] %s1059_s15  ;;  %p666_p1 = scmp.lt.s32.totalorder %s933_s28, 4 }
  0x1e   : > { %s214_s17 = sand.u32 1, %s913_s23   ;;  %p1069_p2 = por %p187_p0, %p186_p13 }
  0x1f   : > { %s635_s8 = sshll.u32 %s214_s17, 6  ;;  %s636_s9 = sshll.u32 %s925_s26, 3 }
  0x20   : > { %s1238_s1 = sld [smem:[#allocation18_spill]]  ;;  %s218_s6 = scalar_lea.vmem [#allocation5], %s635_s8 }
  0x21   : > { %s225_s27 = sshll.u32 %s218_s6, 4  ;;  %p659_p4 = pnand %p666_p1, %p1039_p3  ;;  %s226_s27 = int_to_ptr.vmem [resolvable:$true] %s225_s27 }
  0x22   : > { %p637_p5 = scmp.ge.s32.totalorder %s933_s28, 1  ;;  %s215_s30 = scalar_lea.sflag [#allocation6], %s214_s17 }
  0x23   : > { %s935_s11 = smov 256   ;;  %s936_s23 = smov 128  }
  0x24   : > { %s937_s15 = smov 8   ;;  %p253_p6 = scmp.lt.s32.totalorder %s933_s28, 5 }
  0x26   : > { %s222_s14 = scalar_lea.hbm %s1238_s1, %s636_s9  ;;  %p254_p7 = pnand %p637_p5, %p253_p6 }
  0x27   : > { %s223_s7 = sshll.u32 %s222_s14, 4  ;;  %s259_s29 = sand.u32 (!%p254_p7), 1, %s909_s22   ;;  %s224_s7 = int_to_ptr.hbm [resolvable:$true] %s223_s7 }
  0x28   : > { %661 = dma.hbm_to_vmem [thread:$0]  (!%p659_p4), %s224_s7, 1024, %s226_s27, %s215_s30, %s935_s11, %s936_s23, %s937_s15  }
  0x29   : > { %257 = sbr.rel (%p254_p7) target bundleno = 1255 (0x4e7), region = 40  ;;  %s638_s9 = sshll.u32 (!%p254_p7), %s259_s29, 6 }
  0x2a   : > { %s260_s13 = scalar_lea.sflag (!%p254_p7), [#allocation6], %s259_s29  ;;  %s1082_s8 = scalar_lea.vmem (!%p254_p7), [#allocation5], %s638_s9 }
  0x2e   : > { %884 = dma.done.wait (%p1049_p8), %s260_s13, 1024  }
  0x2f   : > { %886 = vsyncadd (%p1049_p8), %s260_s13, 4294966272  ;;  %s1224_s23 = sand.u32 1, %s897_s19   ;;  %p306_p3 = scmp.lt.s32.totalorder %s921_s25, 1 }
  0x30   : > { %s1092_s27 = sshll.u32 %s1224_s23, 3  ;;  %p318_p9 = scmp.lt.s32.totalorder %s917_s24, 1 }
  0x31   : > { %s307_s6 = scalar_select %p306_p3, %s921_s25, 1 }
  0x32   : > { %s1097_s7 = scalar_select %p318_p9, %s917_s24, 1 }
  0x33   : > { %s1099_s10 = sshll.u32 %s307_s6, 3  ;;  %s305_s26 = scalar_lea.vmem [#allocation8], %s1092_s27 }
  0x34   : > { %s309_s15 = scalar_lea.vmem %s1214_s0, %s1099_s10  ;;  %s313_s30 = scalar_lea.vmem %s1216_s2, %s1099_s10 }
  0x35   : > { %s317_s13 = scalar_lea.vmem %s1217_s3, %s1099_s10  ;;  %s320_s6 = scalar_lea.vmem %s1218_s4, %s1097_s7 }
  0x36   : > { %p643_p8 = scmp.ne.s32.totalorder %s917_s24, 0 }
  0x38   : > { %324 = sbr.rel (%p643_p8) target bundleno = 65 (0x41), region = 48 }
  0x3d   : > { %vm325_vm0 = vcmask 7168   ;;  %v938_v0 = vmov -1e+30   ;;  %v939_v1 = vmov 0.0  }
  0x3e   : > { %326 = vst.msk [vmem:[#allocation2] sm:$0xff] %vm325_vm0, %v938_v0 }
  0x3f   : > { %327 = vst.msk [vmem:[#allocation3] sm:$0xff] %vm325_vm0, %v939_v1 }
  0x40   : > { %328 = vst.msk [vmem:[#allocation4] sm:$0xff] %vm325_vm0, %v939_v1 }
  0x41 PF: > { %v337_v2 = vld [vmem:[%s1082_s8 + $0x38] sm:$0xff]  ;;  %v336_v3 = vld [vmem:[%s1082_s8 + $0x30] sm:$0xff]  ;;  %v940_v4 = vmov 0   ;;  %s646_s1 = sshll.u32 %s917_s24, 7  ;;  %v335_v5 = vld [vmem:[%s1082_s8 + $0x28] sm:$0xff]  ;;  %vm338_vm1 = vcmask 523264   ;;  %v380_v17 = vlaneseq }
  0x42   : > { %350 = vmatpush.msra.mxu0 %v337_v2  ;;  %764 = vset.pattern.permute.xlu0 %v940_v4  ;;  %v362_v6 = vld [vmem:[%s317_s13] sm:$0xff]  ;;  %v334_v7 = vld [vmem:[%s1082_s8 + $0x20] sm:$0xff]  ;;  %v378_v9 = vstv %s646_s1  ;;  %v333_v10 = vld [vmem:[%s1082_s8 + $0x18] sm:$0xff]  ;;  %vm417_vm9 = vcmask 7168   ;;  %p648_p10 = scmp.ge.s32.totalorder %s917_s24, 1 }
  0x43   : > { %365 = vperm.xlu0 %764, %v362_v6   ;;  %v376_v8 = vld [vmem:[%s313_s30] sm:$0xff]  ;;  %v332_v12 = vld [vmem:[%s1082_s8 + $0x10] sm:$0xff]  ;;  %v330_v14 = vld [vmem:[%s1082_s8] sm:$0xff]  ;;  %v1140_v21 = vand.u32 127, %v380_v17 }
  0x44   : > { %351 = vmatpush.msra.mxu0 %v336_v3  ;;  %v379_v11 = vsub.s32 %v376_v8, %v378_v9  ;;  %v331_v13 = vld [vmem:[%s1082_s8 + $0x8] sm:$0xff] }
  0x45   : > { %v329_v15 = vld [vmem:[%s309_s15] sm:$0xff] }
  0x46   : > { %352 = vmatpush.msra.mxu0 %v335_v5  ;;  %v765_v18 = vld [vmem:[%s320_s6] ss:$0 sm:$0xff]  ;;  %vm386_vm5 = vcmp.ge.s32.totalorder %v379_v11, 0  ;;  %vm387_vm6 = vcmp.lt.s32.totalorder %v379_v11, 128 }
  0x47   : > { %vm388_vm8 = vmand %vm386_vm5, %vm387_vm6  ;;  %v415_v45 = vld [vmem:[#allocation4] sm:$0xff] }
  0x48   : > { %353 = vmatpush.msra.mxu0 %v334_v7 }
  0x4a   : > { %354 = vmatpush.msra.mxu0 %v333_v10 }
  0x4b   : > { %383 = vperm.xlu0 %764, %v379_v11  }
  0x4c   : > { %355 = vmatpush.msra.mxu0 %v332_v12 }
  0x4e   : > { %356 = vmatpush.msra.mxu0 %v331_v13 }
  0x50   : > { %357 = vmatpush.msra.mxu0 %v330_v14 }
  0x51   : > { %644 = vmatmul.msk.f32.vlgmr.msra.gmra.mxu0 %vm338_vm1, %v329_v15 }
  0xb5   : > { %v366_v16 = vpop.permute.xlu0 %365 }
  0xbd   : > { %v384_v22 = vpop.permute.xlu0 %383 }
  0xbe   : > { %vm385_vm2 = vcmp.eq.s32.totalorder %v1140_v21, %v384_v22 }
  0xce   : > { %v359_v19 = vpop.f32.mrf.mxu0 }
  0xcf   : > { %v368_v20 = vmul.f32 %v366_v16, %v359_v19 }
  0xd1   : > { %v373_v23 = vmul.f32 %v765_v18, %v368_v20 }
  0xd3   : > { %v645_v24 = vclamps-f32 %v373_v23, 64.0 }
  0xd5   : > { %v389_v25 = vsel %vm385_vm2, %v645_v24, 0.0 }
  0xd6   : > { %390 = vadd.xlane.f32.xlu1 %v389_v25 }
 0x149   : > { %v391_v26 = vpop.xlane.xlu1 %390 }
 0x14a   : > { %v392_v27 = vmul.f32 0.015625, %v391_v26 }
 0x14c   : > { %v393_v28 = vmul.f32 %v392_v27, %v392_v27  ;;  %v408_v41 = vmul.f32 0.87758255, %v392_v27  ;;  %v647_v44 = vadd.f32 -0.23971277, %v392_v27  ;;  %vm411_vm7 = vcmp.gt.f32.partialorder %v392_v27, -0.87758255 }
 0x14e   : > { %v394_v29 = vsub.f32 1.0, %v393_v28 }
 0x150   : > { %v395_v30 = vmax.f32 %v394_v29, 0.0 }
 0x152   : > { %766 = vrsqrt.f32 %v395_v30  ;;  %vm403_vm3 = vcmp.eq.f32.partialorder %v395_v30, inf  ;;  %v406_v38 = vand.u32 2147483648, %v395_v30  ;;  %vm405_vm4 = vcmp.eq.f32.partialorder %v395_v30, 0.0 }
 0x158   : > { %v767_v31 = vpop.eup %766 }
 0x159   : > { %v397_v32 = vmul.f32 %v767_v31, %v395_v30 }
 0x15b   : > { %v398_v33 = vmul.f32 %v767_v31, %v397_v32 }
 0x15d   : > { %v399_v34 = vmul.f32 0.5, %v398_v33 }
 0x15f   : > { %v400_v35 = vsub.f32 1.5, %v399_v34 }
 0x161   : > { %v401_v36 = vmul.f32 %v767_v31, %v400_v35 }
 0x163   : > { %v402_v37 = vmul.f32 %v401_v36, %v395_v30 }
 0x165   : > { %v404_v39 = vsel %vm403_vm3, %v395_v30, %v402_v37 }
 0x166   : > { %v407_v40 = vsel %vm405_vm4, %v406_v38, %v404_v39 }
 0x167   : > { %v409_v42 = vmul.f32 0.47942555, %v407_v40 }
 0x169   : > { %v410_v43 = vsub.f32 %v408_v41, %v409_v42 }
 0x16b   : > { %v413_v46 = vsel %vm411_vm7, %v410_v43, %v647_v44  ;;  %423 = sbr.rel (%p648_p10) target bundleno = 731 (0x2db), region = 52 }
 0x16c   : > { %v414_v47 = vmul.f32 64.0, %v413_v46 }
 0x16e   : > { %v416_v48 = vsel %vm388_vm8, %v414_v47, %v415_v45  ;;  %v419_v49 = vsel %vm385_vm2, %v414_v47, %v645_v24 }
 0x16f   : > { %418 = vst.msk [vmem:[#allocation4] sm:$0xff] %vm417_vm9, %v416_v48 }
 0x170   : > { %425 = vmax.xlane.f32.xlu0 %v419_v49  ;;  %v941_v50 = vmov 0   ;;  %v424_v51 = vld [vmem:[#allocation2] sm:$0xff]  ;;  %v431_v61 = vld [vmem:[#allocation3] sm:$0xff] }
 0x171   : > { %768 = vset.pattern.permute.xlu0 %v941_v50 }
 0x1e3   : > { %v426_v52 = vpop.xlane.xlu0 %425 }
 0x1e4   : > { %v427_v53 = vmax.f32 %v424_v51, %v426_v52 }
 0x1e6   : > { %v428_v54 = vsub.f32 %v424_v51, %v427_v53  ;;  %445 = vst.msk [vmem:[#allocation2] sm:$0xff] %vm417_vm9, %v427_v53  ;;  %435 = vperm.xlu0 %768, %v427_v53  }
 0x1e8   : > { %v429_v59 = vmul.f32 1.442695, %v428_v54 }
 0x258   : > { %v436_v55 = vpop.permute.xlu0 %435 }
 0x259   : > { %v438_v56 = vsub.f32 %v419_v49, %v436_v55 }
 0x25b   : > { %v439_v57 = vmul.f32 1.442695, %v438_v56 }
 0x25d   : > { %769 = vpow2.f32 %v439_v57 }
 0x25e   : > { %771 = vpow2.f32 %v429_v59 }
 0x263   : > { %v770_v58 = vpop.eup %769 }
 0x264   : > { %441 = vadd.xlane.f32.xlu1 %v770_v58  ;;  %v772_v60 = vpop.eup %771 }
 0x265   : > { %v432_v62 = vmul.f32 %v772_v60, %v431_v61 }
 0x2d7   : > { %v442_v63 = vpop.xlane.xlu1 %441 }
 0x2d8   : > { %v443_v0 = vadd.f32 %v442_v63, %v432_v62 }
 0x2da   : > { %444 = vst.msk [vmem:[#allocation3] sm:$0xff] %vm417_vm9, %v443_v0 }
 0x2db PF: > { %p649_p11 = scmp.ne.s32.totalorder %s917_s24, 1 }
 0x2dc   : > { %s450_s8 = ssub.s32 (!%p649_p11), 250, %s646_s1 }
 0x2dd   : > { %449 = sbr.rel (%p649_p11) target bundleno = 1240 (0x4d8), region = 56 }
 0x2e2   : > { %v451_v1 = vstv %s450_s8  ;;  %v942_v3 = vmov 0   ;;  %v454_v4 = vld [vmem:[#allocation2] sm:$0xff]  ;;  %v461_v14 = vld [vmem:[#allocation3] sm:$0xff]  ;;  %v481_v22 = vld [vmem:[#allocation4] sm:$0xff] }
 0x2e3   : > { %vm452_vm10 = vcmp.lt.s32.totalorder %v1140_v21, %v451_v1  ;;  %773 = vset.pattern.permute.xlu0 %v942_v3  ;;  %774 = vset.pattern.permute.xlu1 %v942_v3 }
 0x2e4   : > { %v453_v2 = vsel %vm452_vm10, %v419_v49, -1e+30 }
 0x2e5   : > { %455 = vmax.xlane.f32.xlu0 %v453_v2 }
 0x358   : > { %v456_v5 = vpop.xlane.xlu0 %455 }
 0x359   : > { %v457_v6 = vmax.f32 %v454_v4, %v456_v5 }
 0x35b   : > { %v458_v7 = vsub.f32 %v454_v4, %v457_v6  ;;  %475 = vst.msk [vmem:[#allocation2] sm:$0xff] %vm417_vm9, %v457_v6  ;;  %465 = vperm.xlu0 %773, %v457_v6  }
 0x35d   : > { %v459_v12 = vmul.f32 1.442695, %v458_v7 }
 0x362   : > { %v476_v21 = vld [vmem:[#allocation2] sm:$0xff] }
 0x3cd   : > { %v466_v8 = vpop.permute.xlu0 %465 }
 0x3ce   : > { %v468_v9 = vsub.f32 %v453_v2, %v466_v8 }
 0x3d0   : > { %v469_v10 = vmul.f32 1.442695, %v468_v9 }
 0x3d2   : > { %775 = vpow2.f32 %v469_v10 }
 0x3d3   : > { %777 = vpow2.f32 %v459_v12 }
 0x3d8   : > { %v776_v11 = vpop.eup %775 }
 0x3d9   : > { %471 = vadd.xlane.f32.xlu1 %v776_v11  ;;  %v778_v13 = vpop.eup %777 }
 0x3da   : > { %v462_v15 = vmul.f32 %v778_v13, %v461_v14 }
 0x44c   : > { %v472_v16 = vpop.xlane.xlu1 %471 }
 0x44d   : > { %v473_v17 = vadd.f32 %v472_v16, %v462_v15 }
 0x44f   : > { %474 = vst.msk [vmem:[#allocation3] sm:$0xff] %vm417_vm9, %v473_v17 }
 0x456   : > { %v477_v18 = vld [vmem:[#allocation3] sm:$0xff] }
 0x457   : > { %779 = vlog2.f32 %v477_v18 }
 0x45d   : > { %v780_v19 = vpop.eup %779 }
 0x45e   : > { %v479_v20 = vmul.f32 0.6931472, %v780_v19 }
 0x460   : > { %v480_v23 = vadd.f32 %v479_v20, %v476_v21 }
 0x462   : > { %v482_v24 = vsub.f32 %v480_v23, %v481_v22 }
 0x464   : > { %485 = vperm.xlu1 %774, %v482_v24  }
 0x4d6   : > { %v486_v25 = vpop.permute.xlu1 %485 }
 0x4d7   : > { %488 = vst [vmem:[%s305_s26] sm:$0xff] %v486_v25 }
 0x4d8 PF: > { %s651_s24 = sshll.u32 %s921_s25, 3  ;;  %s502_s14 = sshll.u32 %s305_s26, 4  ;;  %s503_s14 = int_to_ptr.vmem [resolvable:$true] %s502_s14 }
 0x4d9   : > { %s500_s15 = scalar_lea.hbm %s1219_s5, %s651_s24  ;;  %s1239_s29 = sand.u32 1, %s897_s19  }
 0x4da   : > { %s504_s30 = sshll.u32 %s500_s15, 4  ;;  %s490_s9 = scalar_lea.sflag [#allocation7], %s1239_s29  ;;  %s505_s30 = int_to_ptr.hbm [resolvable:$true] %s504_s30 }
 0x4db   : > { %s825_s13 = sshra.s32 %s505_s30, 4  ;;  %s831_s23 = scalar_lea.hbm %s1219_s5, 16  ;;  %s826_s13 = int_to_ptr.hbm [resolvable:$true] %s825_s13 }
 0x4dc   : > { %s827_s6 = scalar_lea.hbm %s826_s13, 8  ;;  %p832_p4 = scmp.lt.s32.totalorder %s826_s13, %s1219_s5 }
 0x4dd   : > { %p828_p13 = scmp.ne.s32.totalorder %s826_s13, %s827_s6  ;;  %p833_p5 = scmp.lt.s32.totalorder %s831_s23, %s827_s6 }
 0x4df   : > { %p829_p0 = pnand %p828_p13, %p1061_p12  ;;  %p834_p6 = por %p833_p5, %p832_p4 }
 0x4e1   : > { %p830_p1 = pneg %p829_p0 }
 0x4e3   : > { %p835_p7 = pnand %p834_p6, %p830_p1 }
 0x4e5   : > { %838 = shalt.err (!%p835_p7)
}
 0x4e6   : > { %656 = dma.vmem_to_hbm [thread:$0]  (%p1061_p12), %s503_s14, 128, %s505_s30, %s490_s9  }
 0x4e7 PF: > { %p667_p3 = scmp.ge.s32.totalorder %s933_s28, 2  ;;  %s516_s26 = sand.u32 1, %s893_s18  }
 0x4e8   : > { %s517_s27 = scalar_lea.sflag [#allocation7], %s516_s26 }
 0x4e9   : > { %p663_p9 = pnand %p667_p3, %p1069_p2 }
 0x4eb   : > { %p664_p8 = pneg %p663_p9 }
 0x4ed   : > { %888 = dma.done.wait (%p664_p8), %s517_s27, 128  }
 0x4ee   : > { %890 = vsyncadd (%p664_p8), %s517_s27, 4294967168  ;;  %s21_s28 = sadd.s32 1, %s933_s28   ;;  %s1240_s17 = sld [smem:[#allocation17_spill]] }
 0x4ef   : > { %p18_p10 = scmp.ge.s32.totalorder %s21_s28, 6   ;;  %s1241_s16 = sld [smem:[#allocation11_spill]] }
 0x4f0   : > { %s1242_s23 = sld [smem:[#allocation16_spill]]  ;;  %s1247_s18 = smov %s897_s19 }
 0x4f1   : > { %s1243_s24 = sld [smem:[#allocation12_spill]]  ;;  %s1248_s19 = smov %s901_s20 }
 0x4f2   : > { %s1244_s25 = sld [smem:[#allocation13_spill]]  ;;  %s1250_s21 = smov %s909_s22 }
 0x4f3   : > { %s1245_s26 = sld [smem:[#allocation14_spill]]  ;;  %20 = sbr.rel (!%p18_p10) target bundleno = 11 (0xb), region = 109 }
 0x4f4   : > { %s1246_s27 = sld [smem:[#allocation15_spill]]  ;;  %s1249_s20 = smov %s1240_s17 }
 0x4f5   : > { %s1251_s22 = smov %s1241_s16 }
 0x4f8   :  { %523 = vsyncpa [#allocation6], 1 }
 0x4f9   :  { %525 = vsyncpa [#allocation6 + $0x1], 1 }
 0x4fa   :  { %526 = vsyncpa [#allocation7], 1 }
 0x4fb   :  { %528 = vsyncpa [#allocation7 + $0x1], 1 }

</bundles_post_ra>
